<compile_context>
chip_gen: v6e
topology: v6e:2x2x1
jax: 0.10.0
libtpu: 0.0.40
codegen_flags: <defaults>
</compile_context>

<pallas_src>
import numpy as np

import jax
import jax.numpy as jnp
from jax import lax
from jax.experimental import pallas as pl
from jax.experimental.pallas import tpu as pltpu


def _round_up(a, b):
    return (a + b - 1) // b * b


def _vmem_capacity_bytes():
    # 128 MiB on v5e/v6e, 64 MiB per TensorCore on v7x; conservative fallback.
    try:
        return int(pltpu.get_tpu_info().vmem_capacity_bytes)
    except Exception:
        return 64 << 20


def _patch_embed_kernel(p_ref, w_ref, s_ref, o_ref):
    # p_ref: (tm, Kp)  bf16, values in {-1, 0, +1}
    # w_ref: (Kp, Ep)  bf16, values in {-1, 0, +1}   (grid-invariant)
    # s_ref: (1,  Ep)  f32 per-output-channel scale  (grid-invariant)
    # o_ref: (tm, Ep)  out dtype
    acc = jnp.dot(p_ref[...], w_ref[...],
                  preferred_element_type=jnp.float32)        # MXU, exact ints
    o_ref[...] = (acc * s_ref[...]).astype(o_ref.dtype)      # scale post-dot


def patch_embed_1w1a(x, weight, move_bias, patch_size, padding=1,
                     tm_target=1024, out_dtype=jnp.float32):
    """x: (B, C, H, W) f32; weight: (E, C, P, P) f32; move_bias: (1, C, 1) f32."""
    B, C, H, W = x.shape
    E = weight.shape[0]
    P = patch_size
    pad = padding

    # ---- plain-JAX glue (bias, binarize, im2col) --------------------------
    # LearnableBias2: torch expand_as right-aligns dims exactly like numpy
    # broadcasting (requires C == H for a (1, C, 1) bias), reproduced here.
    # Cast to bf16 right after the sign: +/-1/0 are exact in bf16, and the
    # im2col transpose then moves half the bytes.
    xa = jnp.sign(x.astype(jnp.float32) + move_bias).astype(jnp.bfloat16)
    xp = jnp.pad(xa, ((0, 0), (0, 0), (pad, pad), (pad, pad)))  # sign(0)==0
    Ho = (H + 2 * pad - P) // P + 1
    Wo = (W + 2 * pad - P) // P + 1
    xp = xp[:, :, :Ho * P, :Wo * P]
    # stride == kernel: im2col is a pure reshape/transpose (no window overlap)
    patches = (xp.reshape(B, C, Ho, P, Wo, P)
                 .transpose(0, 2, 4, 1, 3, 5)                 # (B,Ho,Wo,C,P,P)
                 .reshape(B * Ho * Wo, C * P * P))
    M, K = patches.shape

    # Weight binarization hoisted out of the kernel.
    w2d = jnp.sign(weight.reshape(E, K)).T.astype(jnp.bfloat16)       # (K, E)
    scale = jnp.mean(jnp.abs(weight.astype(jnp.float32)), axis=(1, 2, 3))  # (E,)

    # Zero-pad K to a lane multiple (zeros contribute exactly 0 to the dot);
    # typical ViT shapes (C*P*P = 768) are already aligned -> no-op.
    Kp = _round_up(max(K, 128), 128)
    if Kp != K:
        patches = jnp.pad(patches, ((0, 0), (0, Kp - K)))
        w2d = jnp.pad(w2d, ((0, Kp - K), (0, 0)))

    # Lane-dense output: pad E only when not already a multiple of 128, so the
    # common ViT embed dims (256/512/768/1024) skip both the pad and the
    # trailing column-slice copy.
    Ep = _round_up(max(E, 128), 128)
    if Ep != E:
        w2d = jnp.pad(w2d, ((0, 0), (0, Ep - E)))
        scale = jnp.pad(scale, (0, Ep - E))
    scale_p = scale.reshape(1, Ep).astype(jnp.float32)

    # ---- tile selection against a generation-aware VMEM budget -------------
    out_bytes = int(np.dtype(out_dtype).itemsize)
    vmem_cap = _vmem_capacity_bytes()
    # ~40 MiB usable on v7x (64 MiB physical), ~100 MiB on v5e/v6e (128 MiB).
    vmem_budget = min(100 << 20, max(24 << 20, vmem_cap - (24 << 20)))

    tm = min(_round_up(tm_target, 128), _round_up(M, 128))

    def footprint(t):
        return (2 * t * Kp * 2            # double-buffered bf16 patch tile
                + 2 * Kp * Ep * 2         # weight (constant index_map; DMA'd once)
                + 2 * 8 * Ep * 4          # scale (padded to 8 sublanes)
                + 2 * t * Ep * out_bytes)  # output tile

    while tm > 128 and footprint(tm) > vmem_budget:
        tm -= 128
    # Keep the grid >= 2 steps whenever M allows, so the "parallel" axis can
    # feed both v7x TensorCores (near-free elsewhere: ~0.35 us per step).
    if M > 128:
        tm = min(tm, max(128, _round_up(-(-M // 2), 128)))

    grid_m = pl.cdiv(M, tm)               # NO whole-matrix M padding
    vmem_limit = int(min(max(footprint(tm) + (4 << 20), 16 << 20),
                         max(16 << 20, vmem_cap - (8 << 20))))

    out = pl.pallas_call(
        _patch_embed_kernel,
        out_shape=jax.ShapeDtypeStruct((M, Ep), out_dtype),
        grid_spec=pltpu.PrefetchScalarGridSpec(
            num_scalar_prefetch=0,
            grid=(grid_m,),
            in_specs=[
                pl.BlockSpec((tm, Kp), lambda i: (i, 0)),      # patch tile
                pl.BlockSpec((Kp, Ep), lambda i: (0, 0)),      # binarized W
                pl.BlockSpec((1, Ep), lambda i: (0, 0)),       # per-chan scale
            ],
            out_specs=pl.BlockSpec((tm, Ep), lambda i: (i, 0)),
        ),
        compiler_params=pltpu.CompilerParams(
            dimension_semantics=("parallel",),
            vmem_limit_bytes=vmem_limit),
        cost_estimate=pl.CostEstimate(
            flops=2 * M * Kp * Ep,
            transcendentals=0,
            bytes_accessed=(M * Kp * 2 + Kp * Ep * 2 + Ep * 4
                            + M * Ep * out_bytes)),
    )(patches, w2d, scale_p)

    if Ep != E:
        out = out[:, :E]                  # only when E wasn't lane-aligned
    # flatten(2).transpose(1, 2): (B, E, Ho, Wo) -> (B, Ho*Wo, E); norm=Identity
    return out.reshape(B, Ho * Wo, E)


def reference(x, weight, move_bias, patch_size, padding=1):
    """Pure-JAX reference reproducing the PyTorch forward exactly (f32)."""
    xa = jnp.sign(x + move_bias)
    scale = jnp.mean(jnp.abs(weight), axis=(1, 2, 3), keepdims=True)
    bw = scale * jnp.sign(weight)
    y = lax.conv_general_dilated(
        xa, bw, window_strides=(patch_size, patch_size),
        padding=[(padding, padding), (padding, padding)],
        dimension_numbers=("NCHW", "OIHW", "NCHW"),
        precision=lax.Precision.HIGHEST)
    B, E, Ho, Wo = y.shape
    return y.reshape(B, E, Ho * Wo).transpose(0, 2, 1)


def _check(B, C, H, W, P, E, key, tm_target=1024):
    kx, kw, kb = jax.random.split(key, 3)
    x = jax.random.normal(kx, (B, C, H, W), dtype=jnp.float32)
    # Signed weights so the sign(W) path is actually exercised (module init is
    # rand*0.001, i.e. all-positive; the forward does not depend on the init).
    weight = (jax.random.uniform(kw, (E, C, P, P), dtype=jnp.float32) - 0.5) * 0.002
    move_bias = jax.random.normal(kb, (1, C, 1), dtype=jnp.float32) * 0.1

    out = jax.block_until_ready(
        patch_embed_1w1a(x, weight, move_bias, P, tm_target=tm_target))
    ref = jax.block_until_ready(reference(x, weight, move_bias, P))
    assert out.shape == ref.shape, (out.shape, ref.shape)
    assert jnp.allclose(out, ref, atol=1e-5, rtol=1e-5), float(
        jnp.max(jnp.abs(out - ref)))


if __name__ == "__main__":
    # NOTE: img_size == in_chans so that LearnableBias2's (1, C, 1) bias
    # broadcasts exactly as torch expand_as does in the original module.
    key = jax.random.PRNGKey(0)
    k1, k2, k3 = jax.random.split(key, 3)

    # small shape: single (partial) grid block, M=32 < tm
    _check(B=2, C=16, H=16, W=16, P=4, E=32, key=k1)
    # multi-step grid with a masked edge block (M = 528, tm = 128 -> 5 steps)
    _check(B=33, C=16, H=16, W=16, P=4, E=32, key=k2, tm_target=128)
    # default tiling: >=2-step cap path (M = 528 -> 2 steps of 384)
    _check(B=33, C=16, H=16, W=16, P=4, E=32, key=k3)

    print("KERNEL_OK")
</pallas_src>

<mosaic_0001>
module attributes {stable_mosaic.version = 11 : i64} {
  func.func @_patch_embed_kernel(%arg0: i32, %arg1: memref<128x256xbf16, #tpu.memory_space<vmem>>, %arg2: memref<256x128xbf16, #tpu.memory_space<vmem>>, %arg3: memref<1x128xf32, #tpu.memory_space<vmem>>, %arg4: memref<128x128xf32, #tpu.memory_space<vmem>>) attributes {dimension_semantics = [#tpu.dimension_semantics<parallel>], iteration_bounds = array<i64: 1>, scalar_prefetch = 0 : i64, scratch_operands = 0 : i64, tpu.core_type = #tpu.core_type<tc>, window_params = [{transform_indices = @transform_0, window_bounds = array<i64: 128, 256>}, {pipeline_mode = #tpu.pipeline_mode<synchronous>, transform_indices = @transform_1, window_bounds = array<i64: 256, 128>}, {pipeline_mode = #tpu.pipeline_mode<synchronous>, transform_indices = @transform_2, window_bounds = array<i64: 1, 128>}, {transform_indices = @transform_3, window_bounds = array<i64: 128, 128>}]} {
    %c0 = arith.constant 0 : index
    %c0_0 = arith.constant 0 : index
    %0 = vector.load %arg1[%c0, %c0_0] : memref<128x256xbf16, #tpu.memory_space<vmem>>, vector<128x256xbf16>
    %c0_1 = arith.constant 0 : index
    %c0_2 = arith.constant 0 : index
    %1 = vector.load %arg2[%c0_1, %c0_2] : memref<256x128xbf16, #tpu.memory_space<vmem>>, vector<256x128xbf16>
    %cst = arith.constant dense<0.000000e+00> : vector<128x128xf32>
    %2 = tpu.matmul %0, %1, %cst {dimension_numbers = #tpu.dot_dimension_numbers<[1], [0], [0], [1], [0, 0, 1, 1], [], []>} : vector<128x256xbf16>, vector<256x128xbf16>, vector<128x128xf32> -> vector<128x128xf32>
    %c0_3 = arith.constant 0 : index
    %c0_4 = arith.constant 0 : index
    %3 = vector.load %arg3[%c0_3, %c0_4] : memref<1x128xf32, #tpu.memory_space<vmem>>, vector<1x128xf32>
    %4 = vector.broadcast %3 : vector<1x128xf32> to vector<128x128xf32>
    %5 = arith.mulf %2, %4 : vector<128x128xf32>
    %c0_5 = arith.constant 0 : index
    %c0_6 = arith.constant 0 : index
    %6 = vector.load %arg4[%c0_5, %c0_6] : memref<128x128xf32, #tpu.memory_space<vmem>>, vector<128x128xf32>
    tpu.vector_store %arg4[%c0_5, %c0_6], %5 {strides = array<i32>} : memref<128x128xf32, #tpu.memory_space<vmem>>, vector<128x128xf32>,
    return
  }
  func.func @transform_0(%arg0: i32) -> (i32, i32) {
    %c0_i32 = arith.constant 0 : i32
    %c0_i32_0 = arith.constant 0 : i32
    return %arg0, %c0_i32 : i32, i32
  }
  func.func @transform_1(%arg0: i32) -> (i32, i32) {
    %c0_i32 = arith.constant 0 : i32
    %c0_i32_0 = arith.constant 0 : i32
    %c0_i32_1 = arith.constant 0 : i32
    return %c0_i32, %c0_i32_0 : i32, i32
  }
  func.func @transform_2(%arg0: i32) -> (i32, i32) {
    %c0_i32 = arith.constant 0 : i32
    %c0_i32_0 = arith.constant 0 : i32
    %c0_i32_1 = arith.constant 0 : i32
    return %c0_i32, %c0_i32_0 : i32, i32
  }
  func.func @transform_3(%arg0: i32) -> (i32, i32) {
    %c0_i32 = arith.constant 0 : i32
    %c0_i32_0 = arith.constant 0 : i32
    return %arg0, %c0_i32 : i32, i32
  }
}

</mosaic_0001>

<bundles_post_ra>
// kernel: tpu_custom_call.1
= control target key start
LH: loop header
LB: loop body
LE: loop exit
PB: predicated region body
PF: predicated region fallthrough
CT: control target
= control target key end

     0   :  { %8 = vsyncpa [#allocation3], 0  ;;  %s711_s0 = inlined_call_operand.hbm [shape: bf16[32,256], index: 0, kind: input, shape index: {}]   ;;  %s712_s1 = inlined_call_operand.hbm [shape: bf16[256,128], index: 1, kind: input, shape index: {}]   ;;  %s713_s2 = inlined_call_operand.vmem [shape: f32[1,128], index: 2, kind: input, shape index: {}]   ;;  %s714_s3 = inlined_call_operand.hbm [shape: f32[32,128], index: 3, kind: output, shape index: {}]  }
   0x1   :  { %9 = vsyncpa [#allocation6], 0 }
   0x2   :  { %10 = vsyncpa [#allocation4], 0 }
   0x3   :  { %15 = vsyncadd [#allocation3], 1536  ;;  %s648_s12 = smov [#allocation2]  }
   0x4   :  { %s16_s13 = sshll.u32 %s648_s12, 4  ;;  %s17_s13 = int_to_ptr.vmem [resolvable:$true] %s16_s13 }
   0x5   :  { %s590_s14 = scalar_lea.vmem %s17_s13, 512  ;;  %s594_s15 = scalar_lea.vmem %s17_s13, 2048 }
   0x6   :  { %p591_p0 = scmp.ne.s32.totalorder %s17_s13, %s590_s14  ;;  %p595_p1 = scmp.lt.s32.totalorder %s17_s13, %s17_s13 }
   0x7   :  { %p596_p2 = scmp.lt.s32.totalorder %s594_s15, %s590_s14 }
   0x9   :  { %p597_p3 = por %p596_p2, %p595_p1 }
   0xb   :  { %p598_p4 = pnand %p597_p3, %p591_p0 }
   0xd   :  { %601 = shalt.err (!%p598_p4)
}
   0xe   :  { %s649_s16 = smov 128   ;;  %s650_s17 = smov 8  }
   0xf   :  { %22 = dma.hbm_to_vmem [thread:$0]  %s711_s0, 512, %s17_s13, [#allocation3], %s649_s16, %s649_s16, %s650_s17  }
  0x10   :  { %s651_s20 = smov [#allocation5]  }
  0x11   :  { %s28_s21 = sshll.u32 %s651_s20, 4  ;;  %s29_s21 = int_to_ptr.vmem [resolvable:$true] %s28_s21 }
  0x12   :  { %s610_s22 = scalar_lea.vmem %s29_s21, 2048  ;;  %p615_p6 = scmp.lt.s32.totalorder %s29_s21, %s29_s21 }
  0x13   :  { %p611_p5 = scmp.ne.s32.totalorder %s29_s21, %s610_s22  ;;  %p616_p7 = scmp.lt.s32.totalorder %s610_s22, %s610_s22 }
  0x15   :  { %p617_p8 = por %p616_p7, %p615_p6 }
  0x17   :  { %p618_p9 = pnand %p617_p8, %p611_p5 }
  0x19   :  { %621 = shalt.err (!%p618_p9)
}
  0x1a   :  { %s652_s23 = smov 64   ;;  %s653_s24 = smov 4  }
  0x1b   :  { %34 = dma.hbm_to_vmem [thread:$0]  %s712_s1, 2048, %s29_s21, [#allocation6], %s652_s23, %s652_s23, %s653_s24  }
  0x1c   :  { %642 = dma.done.wait [#allocation3], 2048  }
  0x1d   :  { %643 = vsyncadd [#allocation3], 4294965248 }
  0x1e   :  { %644 = dma.done.wait [#allocation6], 2048  }
  0x1f   :  { %645 = vsyncadd [#allocation6], 4294965248  ;;  %v542_v0 = vld [vmem:[#allocation5 + $0x78] sm:$0xff]   ;;  %v544_v2 = vld [vmem:[#allocation5 + $0x70] sm:$0xff]  }
  0x20   :  { %v543_v1 = vld [vmem:[#allocation5 + $0x38] sm:$0xff]   ;;  %455 = vmatprep.subr.bf16.mxu0 %v542_v0  ;;  %519 = vmatprep.subr.bf16.mxu1 %v542_v0  ;;  %v545_v3 = vld [vmem:[#allocation5 + $0x30] sm:$0xff]   ;;  %v546_v4 = vld [vmem:[#allocation5 + $0x68] sm:$0xff]  }
  0x21   :  { %456 = vmatpush3.bf16.msra.mxu0 %v543_v1  ;;  %527 = vmatpush3.bf16.msra.mxu1 %v543_v1  ;;  %v547_v5 = vld [vmem:[#allocation5 + $0x28] sm:$0xff]   ;;  %v548_v6 = vld [vmem:[#allocation5 + $0x60] sm:$0xff]   ;;  %v550_v8 = vld [vmem:[#allocation5 + $0x58] sm:$0xff]  }
  0x22   :  { %457 = vmatprep.subr.bf16.mxu0 %v544_v2  ;;  %520 = vmatprep.subr.bf16.mxu1 %v544_v2  ;;  %v549_v7 = vld [vmem:[#allocation5 + $0x20] sm:$0xff]   ;;  %v551_v9 = vld [vmem:[#allocation5 + $0x18] sm:$0xff]   ;;  %v552_v10 = vld [vmem:[#allocation5 + $0x50] sm:$0xff]  }
  0x23   :  { %v560_v11 = vld [vmem:[#allocation2 + $0x4] ss:$8 sps:$4 sm:$0xff]   ;;  %v553_v13 = vld [vmem:[#allocation5 + $0x10] sm:$0xff]   ;;  %v558_v18 = vld [vmem:[#allocation2] ss:$8 sps:$4 sm:$0xff]  }
  0x24   :  { %v563_v12 = vld [vmem:[#allocation2 + $0x44] ss:$8 sps:$4 sm:$0xff]   ;;  %300 = vmatprep.mubr.bf16.mxu0 %v560_v11  ;;  %v561_v19 = vld [vmem:[#allocation2 + $0x40] ss:$8 sps:$4 sm:$0xff]   ;;  %v564_v20 = vld [vmem:[#allocation2 + $0x14] ss:$8 sps:$4 sm:$0xff]  }
  0x25   :  { %458 = vmatpush3.bf16.msra.mxu0 %v545_v3  ;;  %528 = vmatpush3.bf16.msra.mxu1 %v545_v3  ;;  %v554_v14 = vld [vmem:[#allocation5 + $0x48] sm:$0xff]   ;;  %v556_v16 = vld [vmem:[#allocation5 + $0x40] sm:$0xff]   ;;  %v566_v21 = vld [vmem:[#allocation2 + $0x54] ss:$8 sps:$4 sm:$0xff]  }
  0x26   :  { %459 = vmatprep.subr.bf16.mxu0 %v546_v4  ;;  %521 = vmatprep.subr.bf16.mxu1 %v546_v4  ;;  %v555_v15 = vld [vmem:[#allocation5 + $0x8] sm:$0xff]   ;;  %v557_v17 = vld [vmem:[#allocation5] sm:$0xff]   ;;  %v568_v22 = vld [vmem:[#allocation2 + $0x10] ss:$8 sps:$4 sm:$0xff]  }
  0x27   :  { %332 = vmatprep.mubr.bf16.mxu1 %v563_v12  ;;  %v569_v23 = vld [vmem:[#allocation2 + $0x50] ss:$8 sps:$4 sm:$0xff]   ;;  %v570_v24 = vld [vmem:[#allocation2 + $0x24] ss:$8 sps:$4 sm:$0xff]   ;;  %v574_v26 = vld [vmem:[#allocation2 + $0x20] ss:$8 sps:$4 sm:$0xff]  }
  0x28   :  { %v572_v25 = vld [vmem:[#allocation2 + $0x64] ss:$8 sps:$4 sm:$0xff]   ;;  %v575_v27 = vld [vmem:[#allocation2 + $0x60] ss:$8 sps:$4 sm:$0xff]   ;;  %v576_v28 = vld [vmem:[#allocation2 + $0x34] ss:$8 sps:$4 sm:$0xff]  }
  0x29   :  { %460 = vmatpush3.bf16.msra.mxu0 %v547_v5  ;;  %529 = vmatpush3.bf16.msra.mxu1 %v547_v5  ;;  %v578_v29 = vld [vmem:[#allocation2 + $0x74] ss:$8 sps:$4 sm:$0xff]   ;;  %v580_v30 = vld [vmem:[#allocation2 + $0x30] ss:$8 sps:$4 sm:$0xff]   ;;  %v687_v35 = vld [vmem:[%s713_s2] ss:$0 sm:$0xff] }
  0x2a   :  { %461 = vmatprep.subr.bf16.mxu0 %v548_v6  ;;  %522 = vmatprep.subr.bf16.mxu1 %v548_v6  ;;  %v581_v31 = vld [vmem:[#allocation2 + $0x70] ss:$8 sps:$4 sm:$0xff]  }
  0x2d   :  { %462 = vmatpush3.bf16.msra.mxu0 %v549_v7  ;;  %530 = vmatpush3.bf16.msra.mxu1 %v549_v7 }
  0x2e   :  { %463 = vmatprep.subr.bf16.mxu0 %v550_v8  ;;  %523 = vmatprep.subr.bf16.mxu1 %v550_v8 }
  0x31   :  { %464 = vmatpush3.bf16.msra.mxu0 %v551_v9  ;;  %531 = vmatpush3.bf16.msra.mxu1 %v551_v9 }
  0x32   :  { %465 = vmatprep.subr.bf16.mxu0 %v552_v10  ;;  %524 = vmatprep.subr.bf16.mxu1 %v552_v10 }
  0x35   :  { %466 = vmatpush3.bf16.msra.mxu0 %v553_v13  ;;  %532 = vmatpush3.bf16.msra.mxu1 %v553_v13 }
  0x36   :  { %467 = vmatprep.subr.bf16.mxu0 %v554_v14  ;;  %525 = vmatprep.subr.bf16.mxu1 %v554_v14 }
  0x39   :  { %468 = vmatpush3.bf16.msra.mxu0 %v555_v15  ;;  %533 = vmatpush3.bf16.msra.mxu1 %v555_v15 }
  0x3a   :  { %469 = vmatprep.subr.bf16.mxu0 %v556_v16  ;;  %526 = vmatprep.subr.bf16.mxu1 %v556_v16 }
  0x3d   :  { %470 = vmatpush3.bf16.msra.mxu0 %v557_v17  ;;  %534 = vmatpush3.bf16.msra.mxu1 %v557_v17 }
  0x40   :  { %301 = vmatmul.mubr.bf16.vlgmr.msra.gmra.mxu0 %v558_v18  ;;  %333 = vmatmul.mubr.bf16.vlgmr.msra.gmra.mxu1 %v561_v19 }
  0x41   :  { %308 = vmatprep.mubr.bf16.mxu0 %v564_v20  ;;  %340 = vmatprep.mubr.bf16.mxu1 %v566_v21 }
  0x48   :  { %309 = vmatmul.mubr.bf16.gmra.mxu0 %v568_v22  ;;  %341 = vmatmul.mubr.bf16.gmra.mxu1 %v569_v23 }
  0x49   :  { %316 = vmatprep.mubr.bf16.mxu0 %v570_v24  ;;  %348 = vmatprep.mubr.bf16.mxu1 %v572_v25 }
  0x50   :  { %317 = vmatmul.mubr.bf16.gmra.mxu0 %v574_v26  ;;  %349 = vmatmul.mubr.bf16.gmra.mxu1 %v575_v27 }
  0x51   :  { %324 = vmatprep.mubr.bf16.mxu0 %v576_v28  ;;  %356 = vmatprep.mubr.bf16.mxu1 %v578_v29 }
  0x58   :  { %325 = vmatmul.mubr.bf16.gmra.mxu0 %v580_v30  ;;  %357 = vmatmul.mubr.bf16.gmra.mxu1 %v581_v31 }
 0x100   :  { %v471_v32 = vpop.f32.mrf.mxu0  ;;  %v495_v33 = vpop.f32.mrf.mxu1 }
 0x102   :  { %v472_v34 = vpop.f32.mrf.mxu0  ;;  %v496_v36 = vpop.f32.mrf.mxu1 }
 0x103   :  { %v473_v37 = vadd.f32 %v472_v34, %v471_v32  ;;  %v497_v38 = vadd.f32 %v496_v36, %v495_v33 }
 0x104   :  { %v474_v39 = vpop.f32.mrf.mxu0  ;;  %v498_v40 = vpop.f32.mrf.mxu1 }
 0x105   :  { %v372_v41 = vmul.f32 %v473_v37, %v687_v35  ;;  %v380_v42 = vmul.f32 %v497_v38, %v687_v35 }
 0x106   :  { %v475_v43 = vpop.f32.mrf.mxu0  ;;  %v499_v44 = vpop.f32.mrf.mxu1 }
 0x107   :  { %388 = vst [vmem:[#allocation7] sm:$0xff] %v372_v41  ;;  %396 = vst [vmem:[#allocation7 + $0x40] sm:$0xff] %v380_v42  ;;  %v476_v45 = vadd.f32 %v475_v43, %v474_v39  ;;  %v500_v46 = vadd.f32 %v499_v44, %v498_v40 }
 0x108   :  { %v477_v47 = vpop.f32.mrf.mxu0  ;;  %v501_v48 = vpop.f32.mrf.mxu1 }
 0x109   :  { %v373_v49 = vmul.f32 %v476_v45, %v687_v35  ;;  %v381_v50 = vmul.f32 %v500_v46, %v687_v35 }
 0x10a   :  { %v478_v51 = vpop.f32.mrf.mxu0  ;;  %v502_v52 = vpop.f32.mrf.mxu1 }
 0x10b   :  { %389 = vst [vmem:[#allocation7 + $0x8] sm:$0xff] %v373_v49  ;;  %397 = vst [vmem:[#allocation7 + $0x48] sm:$0xff] %v381_v50  ;;  %v479_v53 = vadd.f32 %v478_v51, %v477_v47  ;;  %v503_v54 = vadd.f32 %v502_v52, %v501_v48 }
 0x10c   :  { %v480_v55 = vpop.f32.mrf.mxu0  ;;  %v504_v56 = vpop.f32.mrf.mxu1 }
 0x10d   :  { %v374_v57 = vmul.f32 %v479_v53, %v687_v35  ;;  %v382_v58 = vmul.f32 %v503_v54, %v687_v35 }
 0x10e   :  { %v481_v59 = vpop.f32.mrf.mxu0  ;;  %v505_v60 = vpop.f32.mrf.mxu1 }
 0x10f   :  { %390 = vst [vmem:[#allocation7 + $0x10] sm:$0xff] %v374_v57  ;;  %398 = vst [vmem:[#allocation7 + $0x50] sm:$0xff] %v382_v58  ;;  %v482_v61 = vadd.f32 %v481_v59, %v480_v55  ;;  %v506_v62 = vadd.f32 %v505_v60, %v504_v56 }
 0x110   :  { %v483_v63 = vpop.f32.mrf.mxu0  ;;  %v507_v0 = vpop.f32.mrf.mxu1 }
 0x111   :  { %v375_v1 = vmul.f32 %v482_v61, %v687_v35  ;;  %v383_v2 = vmul.f32 %v506_v62, %v687_v35 }
 0x112   :  { %v484_v3 = vpop.f32.mrf.mxu0  ;;  %v508_v4 = vpop.f32.mrf.mxu1 }
 0x113   :  { %391 = vst [vmem:[#allocation7 + $0x18] sm:$0xff] %v375_v1  ;;  %399 = vst [vmem:[#allocation7 + $0x58] sm:$0xff] %v383_v2  ;;  %v485_v5 = vadd.f32 %v484_v3, %v483_v63  ;;  %v509_v6 = vadd.f32 %v508_v4, %v507_v0 }
 0x114   :  { %v486_v7 = vpop.f32.mrf.mxu0  ;;  %v510_v8 = vpop.f32.mrf.mxu1 }
 0x115   :  { %v376_v9 = vmul.f32 %v485_v5, %v687_v35  ;;  %v384_v10 = vmul.f32 %v509_v6, %v687_v35 }
 0x116   :  { %v487_v11 = vpop.f32.mrf.mxu0  ;;  %v511_v12 = vpop.f32.mrf.mxu1 }
 0x117   :  { %392 = vst [vmem:[#allocation7 + $0x20] sm:$0xff] %v376_v9  ;;  %400 = vst [vmem:[#allocation7 + $0x60] sm:$0xff] %v384_v10  ;;  %v488_v13 = vadd.f32 %v487_v11, %v486_v7  ;;  %v512_v14 = vadd.f32 %v511_v12, %v510_v8 }
 0x118   :  { %v489_v15 = vpop.f32.mrf.mxu0  ;;  %v513_v16 = vpop.f32.mrf.mxu1 }
 0x119   :  { %v377_v17 = vmul.f32 %v488_v13, %v687_v35  ;;  %v385_v18 = vmul.f32 %v512_v14, %v687_v35 }
 0x11a   :  { %v490_v19 = vpop.f32.mrf.mxu0  ;;  %v514_v20 = vpop.f32.mrf.mxu1 }
 0x11b   :  { %393 = vst [vmem:[#allocation7 + $0x28] sm:$0xff] %v377_v17  ;;  %401 = vst [vmem:[#allocation7 + $0x68] sm:$0xff] %v385_v18  ;;  %v491_v21 = vadd.f32 %v490_v19, %v489_v15  ;;  %v515_v22 = vadd.f32 %v514_v20, %v513_v16 }
 0x11c   :  { %v492_v23 = vpop.f32.mrf.mxu0  ;;  %v516_v24 = vpop.f32.mrf.mxu1 }
 0x11d   :  { %v378_v25 = vmul.f32 %v491_v21, %v687_v35  ;;  %v386_v26 = vmul.f32 %v515_v22, %v687_v35 }
 0x11e   :  { %v493_v27 = vpop.f32.mrf.mxu0  ;;  %v517_v28 = vpop.f32.mrf.mxu1 }
 0x11f   :  { %394 = vst [vmem:[#allocation7 + $0x30] sm:$0xff] %v378_v25  ;;  %402 = vst [vmem:[#allocation7 + $0x70] sm:$0xff] %v386_v26  ;;  %v494_v29 = vadd.f32 %v493_v27, %v492_v23  ;;  %v518_v30 = vadd.f32 %v517_v28, %v516_v24 }
 0x121   :  { %v379_v31 = vmul.f32 %v494_v29, %v687_v35  ;;  %v387_v32 = vmul.f32 %v518_v30, %v687_v35 }
 0x123   :  { %395 = vst [vmem:[#allocation7 + $0x38] sm:$0xff] %v379_v31  ;;  %403 = vst [vmem:[#allocation7 + $0x78] sm:$0xff] %v387_v32 }
 0x124   :  { %408 = vsyncadd [#allocation4], 1536  ;;  %s654_s2 = smov [#allocation7]  }
 0x125   :  { %s409_s27 = sshll.u32 %s654_s2, 4  ;;  %s410_s27 = int_to_ptr.vmem [resolvable:$true] %s409_s27 }
 0x126   :  { %s622_s28 = scalar_lea.vmem %s410_s27, 512  ;;  %s626_s29 = scalar_lea.vmem %s410_s27, 2048 }
 0x127   :  { %p623_p10 = scmp.ne.s32.totalorder %s410_s27, %s622_s28  ;;  %p627_p11 = scmp.lt.s32.totalorder %s410_s27, %s410_s27 }
 0x128   :  { %p628_p12 = scmp.lt.s32.totalorder %s626_s29, %s622_s28 }
 0x12a   :  { %p629_p13 = por %p628_p12, %p627_p11 }
 0x12c   :  { %p630_p0 = pnand %p629_p13, %p623_p10 }
 0x12e   :  { %633 = shalt.err (!%p630_p0)
}
 0x12f   :  { %415 = dma.vmem_to_hbm [thread:$0]  %s410_s27, 512, %s714_s3, [#allocation4], %s649_s16, %s649_s16, %s650_s17  }
 0x130   :  { %646 = dma.done.wait [#allocation4], 2048  }
 0x131   :  { %647 = vsyncadd [#allocation4], 4294965248 }
 0x132   :  { %419 = vsyncpa [#allocation3], 1 }
 0x133   :  { %420 = vsyncpa [#allocation6], 1 }
 0x134   :  { %421 = vsyncpa [#allocation4], 1 }

</bundles_post_ra>
